<compile_context>
chip_gen: v7x
topology: tpu7x:2x2x1
jax: 0.10.0
libtpu: 0.0.40
codegen_flags: <defaults>
</compile_context>

<pallas_src>
import functools

import jax
import jax.numpy as jnp
from jax.experimental import pallas as pl
from jax.experimental.pallas import tpu as pltpu

DIMS = [768, 1024, 128, 64, 16, 1]
LANE_PAD = 128  # lane-dense width for the folded [768, 1] weight


def _round_up(x, m):
    return (x + m - 1) // m * m


def mlp_kernel(x_ref, w_ref, b_ref, o_ref):
    """One batch tile of the fully folded eval-mode MLP.

    x_ref: (bm, 768) f32      w_ref: (768, 128) f32 (only column 0 live)
    b_ref: (1, 128)  f32      o_ref: (bm, 1)    f32
    """
    x = x_ref[...]
    h = jnp.dot(x, w_ref[...], preferred_element_type=jnp.float32) + b_ref[...]
    # Columns 1..127 of w/b are exactly zero, so the lane reduction recovers
    # column 0 exactly while keeping the HBM writeback to a single column.
    o_ref[...] = jnp.sum(h, axis=-1, keepdims=True).astype(o_ref.dtype)


def init_params(key):
    """nn.Linear-style init (uniform +-1/sqrt(fan_in)).

    Weights stored [in_features, out_features]; biases [1, out_features].
    """
    params = []
    for fan_in, fan_out in zip(DIMS[:-1], DIMS[1:]):
        key, kw, kb = jax.random.split(key, 3)
        bound = 1.0 / (fan_in ** 0.5)
        w = jax.random.uniform(kw, (fan_in, fan_out), jnp.float32, -bound, bound)
        b = jax.random.uniform(kb, (1, fan_out), jnp.float32, -bound, bound)
        params.append((w, b))
    return params


def prepare_params(raw_params):
    """Fold the entire eval-mode network into one affine map, in f32.

    Valid because every Dropout is identity in eval mode and there are no
    nonlinearities.  Returns (w_pad [768,128], b_pad [1,128]) where only
    column 0 is live; the padding columns are exactly zero.
    """
    w_all, b_all = raw_params[0]
    for w, b in raw_params[1:]:
        b_all = b_all @ w + b
        w_all = w_all @ w
    w_pad = jnp.pad(w_all, ((0, 0), (0, LANE_PAD - w_all.shape[1])))
    b_pad = jnp.pad(b_all, ((0, 0), (0, LANE_PAD - b_all.shape[1])))
    return w_pad.astype(jnp.float32), b_pad.astype(jnp.float32)


@functools.partial(jax.jit, static_argnames=("block_b",))
def mlp_forward(embed, w_pad, b_pad, *, block_b=512):
    """embed: [B, 768] f32 -> [B, 1] f32."""
    B, D_in = embed.shape
    assert D_in == DIMS[0]

    # Big batch tiles (amortize per-grid-step overhead on v5e/v6e), but cap
    # at ceil(B/2) rounded to the f32 sublane multiple of 8 so grid >= 2 and
    # both v7x TensorCores are used whenever B > 8.
    bm = max(8, min(block_b, _round_up(-(-B // 2), 8)))
    Bp = _round_up(B, bm)
    x = embed if Bp == B else jnp.pad(embed, ((0, Bp - B), (0, 0)))

    grid = (Bp // bm,)

    in_specs = [
        pl.BlockSpec((bm, DIMS[0]), lambda i: (i, 0)),      # embed tile
        pl.BlockSpec(w_pad.shape, lambda i: (0, 0)),        # folded weight (resident)
        pl.BlockSpec(b_pad.shape, lambda i: (0, 0)),        # folded bias (resident)
    ]
    out_spec = pl.BlockSpec((bm, 1), lambda i: (i, 0))

    flops = 2 * Bp * DIMS[0] * LANE_PAD                     # padded MXU pass (tiny)
    bytes_accessed = (Bp * DIMS[0] * 4                      # embed read (roofline)
                      + w_pad.size * 4 + b_pad.size * 4     # folded params
                      + Bp * 4)                             # column output

    out = pl.pallas_call(
        mlp_kernel,
        out_shape=jax.ShapeDtypeStruct((Bp, 1), jnp.float32),
        grid_spec=pltpu.PrefetchScalarGridSpec(
            num_scalar_prefetch=0,
            grid=grid,
            in_specs=in_specs,
            out_specs=out_spec,
        ),
        compiler_params=pltpu.CompilerParams(
            dimension_semantics=("parallel",),
            vmem_limit_bytes=32 << 20,   # trivial residency; safe on v7x's 64 MiB
        ),
        cost_estimate=pl.CostEstimate(
            flops=flops, transcendentals=0, bytes_accessed=bytes_accessed),
    )(x, w_pad, b_pad)

    return out[:B]


def mlp_reference_f32(embed, raw_params):
    """Pure f32 layer-by-layer module forward (eval-mode dropout = identity)."""
    h = embed
    for w, b in raw_params:
        h = h @ w + b
    return h


if __name__ == "__main__":
    key = jax.random.PRNGKey(0)
    key, k_embed = jax.random.split(key)

    B = 16  # small batch; still exercises a 2-tile grid (bm = 8)
    embed = jax.random.normal(k_embed, (B, DIMS[0]), dtype=jnp.float32)
    raw_params = init_params(key)
    w_pad, b_pad = prepare_params(raw_params)

    out = mlp_forward(embed, w_pad, b_pad)
    out = jax.block_until_ready(out)
    assert out.shape == (B, 1)

    # Exact-arithmetic mirror of the kernel (same folded f32 affine map, XLA).
    ref_folded = embed @ w_pad[:, :1] + b_pad[:, :1]
    assert jnp.allclose(out, ref_folded, atol=2e-3, rtol=2e-3), \
        "mismatch vs folded f32 reference"

    # Layer-by-layer f32 forward of the original module (eval mode).
    ref_layers = mlp_reference_f32(embed, raw_params)
    assert jnp.allclose(out, ref_layers, atol=1e-2, rtol=1e-2), \
        "mismatch vs layered f32 reference"

    print("KERNEL_OK")
</pallas_src>

<mosaic_0001>
module attributes {stable_mosaic.version = 11 : i64} {
  func.func @mlp_kernel(%arg0: i32, %arg1: memref<8x768xf32, #tpu.memory_space<vmem>>, %arg2: memref<768x128xf32, #tpu.memory_space<vmem>>, %arg3: memref<1x128xf32, #tpu.memory_space<vmem>>, %arg4: memref<8x1xf32, #tpu.memory_space<vmem>>) attributes {dimension_semantics = [#tpu.dimension_semantics<parallel>], iteration_bounds = array<i64: 2>, scalar_prefetch = 0 : i64, scratch_operands = 0 : i64, tpu.core_type = #tpu.core_type<tc>, window_params = [{transform_indices = @transform_0, window_bounds = array<i64: 8, 768>}, {pipeline_mode = #tpu.pipeline_mode<synchronous>, transform_indices = @transform_1, window_bounds = array<i64: 768, 128>}, {pipeline_mode = #tpu.pipeline_mode<synchronous>, transform_indices = @transform_2, window_bounds = array<i64: 1, 128>}, {transform_indices = @transform_3, window_bounds = array<i64: 8, 1>}]} {
    %c0 = arith.constant 0 : index
    %c0_0 = arith.constant 0 : index
    %0 = vector.load %arg1[%c0, %c0_0] : memref<8x768xf32, #tpu.memory_space<vmem>>, vector<8x768xf32>
    %c0_1 = arith.constant 0 : index
    %c0_2 = arith.constant 0 : index
    %1 = vector.load %arg2[%c0_1, %c0_2] : memref<768x128xf32, #tpu.memory_space<vmem>>, vector<768x128xf32>
    %cst = arith.constant dense<0.000000e+00> : vector<8x128xf32>
    %2 = tpu.matmul %0, %1, %cst {dimension_numbers = #tpu.dot_dimension_numbers<[1], [0], [0], [1], [0, 0, 1, 1], [], []>} : vector<8x768xf32>, vector<768x128xf32>, vector<8x128xf32> -> vector<8x128xf32>
    %c0_3 = arith.constant 0 : index
    %c0_4 = arith.constant 0 : index
    %3 = vector.load %arg3[%c0_3, %c0_4] : memref<1x128xf32, #tpu.memory_space<vmem>>, vector<1x128xf32>
    %4 = vector.broadcast %3 : vector<1x128xf32> to vector<8x128xf32>
    %5 = arith.addf %2, %4 : vector<8x128xf32>
    %cst_5 = arith.constant dense<0.000000e+00> : vector<8xf32>
    %6 = vector.multi_reduction <add>, %5, %cst_5 [1] : vector<8x128xf32> to vector<8xf32>
    %7 = vector.shape_cast %6 : vector<8xf32> to vector<8x1xf32>
    %c0_6 = arith.constant 0 : index
    %c0_7 = arith.constant 0 : index
    %8 = vector.load %arg4[%c0_6, %c0_7] : memref<8x1xf32, #tpu.memory_space<vmem>>, vector<8x1xf32>
    tpu.vector_store %arg4[%c0_6, %c0_7], %7 {strides = array<i32>} : memref<8x1xf32, #tpu.memory_space<vmem>>, vector<8x1xf32>,
    return
  }
  func.func @transform_0(%arg0: i32) -> (i32, i32) {
    %c0_i32 = arith.constant 0 : i32
    %c0_i32_0 = arith.constant 0 : i32
    return %arg0, %c0_i32 : i32, i32
  }
  func.func @transform_1(%arg0: i32) -> (i32, i32) {
    %c0_i32 = arith.constant 0 : i32
    %c0_i32_0 = arith.constant 0 : i32
    %c0_i32_1 = arith.constant 0 : i32
    return %c0_i32, %c0_i32_0 : i32, i32
  }
  func.func @transform_2(%arg0: i32) -> (i32, i32) {
    %c0_i32 = arith.constant 0 : i32
    %c0_i32_0 = arith.constant 0 : i32
    %c0_i32_1 = arith.constant 0 : i32
    return %c0_i32, %c0_i32_0 : i32, i32
  }
  func.func @transform_3(%arg0: i32) -> (i32, i32) {
    %c0_i32 = arith.constant 0 : i32
    %c0_i32_0 = arith.constant 0 : i32
    return %arg0, %c0_i32 : i32, i32
  }
}

</mosaic_0001>

<bundles_post_ra>
// kernel: mlp_forward.1
= control target key start
LH: loop header
LB: loop body
LE: loop exit
PB: predicated region body
PF: predicated region fallthrough
CT: control target
= control target key end

     0   :  { %8 = vsyncpa [#allocation3], 0  ;;  %s1139_s0 = inlined_call_operand.hbm [shape: f32[16,768], index: 0, kind: input, shape index: {}]   ;;  %s1140_s1 = inlined_call_operand.hbm [shape: f32[768,128], index: 1, kind: input, shape index: {}]   ;;  %s1141_s2 = inlined_call_operand.vmem [shape: f32[1,128], index: 2, kind: input, shape index: {}]   ;;  %s1142_s3 = inlined_call_operand.vmem [shape: f32[16,1], index: 3, kind: output, shape index: {}]  }
   0x1   :  { %10 = vsyncpa [#allocation3 + $0x1], 0 }
   0x2   :  { %11 = vsyncpa [#allocation5], 0  ;;  %s989_s12 = smov 0   ;;  %s991_s13 = smov 0  }
   0x3   :  { %s993_s14 = smov 0   ;;  %s995_s15 = smov 0  }
   0x4 LB: > { %s1008_s16 = sadd.s32 4294967295, %s963_s15   ;;  %p37_p0 = scmp.ne.s32.totalorder %s955_s13, %s951_s12  ;;  %s963_s15 = sphi %s995_s15, %s1157_s15   ;;  %s959_s14 = sphi %s993_s14, %s1156_s14   ;;  %s955_s13 = sphi %s991_s13, %s1155_s13   ;;  %s951_s12 = sphi %s989_s12, %s1154_s12  }
   0x5   : > { %p1143_p1 = scmp.eq.s32.totalorder %s1008_s16, 0  ;;  %p601_p2 = scmp.ge.s32.totalorder %s963_s15, 1 }
   0x6   : > { %p116_p3 = scmp.lt.s32.totalorder %s963_s15, 3  ;;  %s965_s19 = smov [#allocation4]  }
   0x7   : > { %p1016_p4 = por %p1143_p1, %p37_p0  ;;  %s128_s20 = sshll.u32 %s965_s19, 4  ;;  %s129_s20 = int_to_ptr.vmem [resolvable:$true] %s128_s20 }
   0x8   : > { %p1020_p5 = pnand %p601_p2, %p116_p3  ;;  %s1033_s22 = sadd.s32 1, %s963_s15  }
   0x9   : > { %s1146_s17 = scalar_select %p1016_p4, 1, 0 }
   0xa   : > { %s1147_s18 = scalar_select %p1020_p5, 1, 0 }
   0xb   : > { %p821_p6 = pneg %p1020_p5  ;;  %s24_s23 = sadd.s32 1, %s959_s14 }
   0xc   : > { %s21_s24 = ssub.s32 %s963_s15, %s1033_s22  ;;  %s867_s27 = scalar_lea.hbm %s1140_s1, 12288 }
   0xd   : > { %p1028_p7 = pnand %p821_p6, %p1143_p1  ;;  %p868_p8 = scmp.ne.s32.totalorder %s1140_s1, %s867_s27 }
   0xe   : > { %p874_p12 = scmp.lt.u32.totalorder %s867_s27, %s1140_s1 }
   0xf   : > { %p869_p9 = pneg %p1028_p7 }
  0x11   : > { %p870_p10 = pnand %p869_p9, %p868_p8 }
  0x13   : > { %p871_p11 = pneg %p870_p10 }
  0x15   : > { %p876_p13 = pnand %p874_p12, %p871_p11 }
  0x17   : > { %879 = shalt.err (!%p876_p13)
}
  0x18   : > { %s880_s5 = scalar_lea.vmem %s129_s20, 12288  ;;  %p888_p6 = scmp.lt.s32.totalorder %s129_s20, %s129_s20 }
  0x19   : > { %p881_p0 = scmp.ne.s32.totalorder %s129_s20, %s880_s5  ;;  %p889_p1 = scmp.lt.s32.totalorder %s880_s5, %s880_s5 }
  0x1b   : > { %p883_p2 = pnand %p881_p0, %p869_p9  ;;  %p890_p4 = por %p889_p1, %p888_p6 }
  0x1d   : > { %p884_p3 = pneg %p883_p2 }
  0x1f   : > { %p891_p5 = pnand %p890_p4, %p884_p3 }
  0x21   : > { %894 = shalt.err (!%p891_p5)
}
  0x22   : > { %s966_s6 = smov 128   ;;  %s967_s7 = smov 8  }
  0x23   : > { %824 = dma.hbm_to_vmem [thread:$0]  (!%p1028_p7), %s1140_s1, 12288, %s129_s20, [#allocation5], %s966_s6, %s966_s6, %s967_s7  }
  0x24   : > { %p22_p8 = scmp.eq.s32.totalorder %s21_s24, 0  ;;  %p31_p9 = scmp.ne.s32.totalorder %s959_s14, %s955_s13 }
  0x25   : > { %p32_p1 = scmp.eq.s32.totalorder %s963_s15, 0  ;;  %p830_p4 = scmp.lt.s32.totalorder %s963_s15, 2 }
  0x26   : > { %s1059_s10 = scalar_select %p22_p8, %s959_s14, %s24_s23  }
  0x27   : > { %p33_p5 = por %p32_p1, %p31_p9  ;;  %s145_s11 = sand.u32 1, %s959_s14  }
  0x28   : > { %s812_s12 = smul.u32 48, %s145_s11  ;;  %s900_s30 = scalar_lea.hbm %s1139_s0, 1536 }
  0x29   : > { %s813_s19 = smul.u32 768, %s963_s15  ;;  %p1063_p10 = pnand %p830_p4, %p33_p5 }
  0x2a   : > { %s149_s23 = scalar_lea.vmem [#allocation2], %s812_s12  ;;  %s146_s15 = scalar_lea.sflag [#allocation3], %s145_s11 }
  0x2b   : > { %s1070_s20 = scalar_lea.hbm %s1139_s0, %s813_s19  ;;  %s157_s24 = sshll.u32 %s149_s23, 4  ;;  %s1072_s24 = int_to_ptr.vmem [resolvable:$true] %s157_s24 }
  0x2c   : > { %s895_s27 = scalar_lea.hbm %s1070_s20, 768  ;;  %p897_p11 = pneg %p1063_p10 }
  0x2d   : > { %p896_p7 = scmp.ne.s32.totalorder %s1070_s20, %s895_s27  ;;  %p901_p0 = scmp.lt.u32.totalorder %s1070_s20, %s1139_s0 }
  0x2e   : > { %p902_p2 = scmp.lt.u32.totalorder %s900_s30, %s895_s27  ;;  %p904_p6 = scmp.lt.u32.totalorder %s895_s27, %s1070_s20 }
  0x2f   : > { %p898_p12 = pnand %p897_p11, %p896_p7 }
  0x30   : > { %p903_p3 = por %p902_p2, %p901_p0 }
  0x31   : > { %p899_p13 = pneg %p898_p12 }
  0x32   : > { %p905_p8 = por %p904_p6, %p903_p3 }
  0x34   : > { %p906_p9 = pnand %p905_p8, %p899_p13 }
  0x36   : > { %909 = shalt.err (!%p906_p9)
}
  0x37   : > { %s910_s6 = scalar_lea.vmem %s1072_s24, 768  ;;  %s968_s7 = smov [#allocation2]  }
  0x38   : > { %p911_p1 = scmp.ne.s32.totalorder %s1072_s24, %s910_s6  ;;  %s915_s8 = sshll.u32 %s968_s7, 4  ;;  %s916_s8 = int_to_ptr.vmem [resolvable:$false] %s915_s8 }
  0x39   : > { %s917_s9 = scalar_lea.vmem %s916_s8, 1536  ;;  %p918_p7 = scmp.lt.s32.totalorder %s1072_s24, %s916_s8 }
  0x3a   : > { %p913_p4 = pnand %p911_p1, %p897_p11  ;;  %p919_p12 = scmp.lt.s32.totalorder %s917_s9, %s910_s6 }
  0x3c   : > { %p914_p5 = pneg %p913_p4  ;;  %p920_p0 = por %p919_p12, %p918_p7 }
  0x3e   : > { %p921_p2 = pnand %p920_p0, %p914_p5 }
  0x40   : > { %924 = shalt.err (!%p921_p2)
}
  0x41   : > { %828 = dma.hbm_to_vmem [thread:$0]  (!%p1063_p10), %s1070_s20, 768, %s1072_s24, %s146_s15  }
  0x42   : > { %p1150_p13 = scmp.ne.s32.totalorder %s1147_s18, 0 }
  0x43   : > { %s168_s11 = sand.u32 (!%p1150_p13), 1, %s955_s13   ;;  %p1151_p11 = scmp.ne.s32.totalorder (!%p1150_p13), %s1146_s17, 0 }
  0x44   : > { %166 = sbr.rel (%p1150_p13) target bundleno = 506 (0x1fa), region = 32  ;;  %s169_s19 = scalar_lea.sflag (!%p1150_p13), [#allocation3], %s168_s11 }
  0x45   : > { %s814_s12 = smul.u32 (!%p1150_p13), 48, %s168_s11 }
  0x47   : > { %s1102_s26 = scalar_lea.vmem (!%p1150_p13), [#allocation2], %s814_s12 }
  0x4b   : > { %942 = dma.done.wait (%p1151_p11), %s169_s19, 768  }
  0x4c   : > { %944 = vsyncadd (%p1151_p11), %s169_s19, 4294966528  ;;  %p1152_p3 = scmp.eq.s32.totalorder %s1008_s16, 0 }
  0x4e   : > { %946 = dma.done.wait (%p1152_p3), [#allocation5], 12288   ;;  %p1153_p10 = pmov %p1152_p3 }
  0x4f   : > { %v224_v0 = vld [vmem:[#allocation4 + $0x80] sm:$0xff]  ;;  %v225_v1 = vld [vmem:[#allocation4 + $0x88] sm:$0xff]  ;;  %v226_v11 = vld [vmem:[#allocation4 + $0x90] sm:$0xff]  ;;  %p198_p6 = scmp.lt.s32.totalorder %s1008_s16, 1  ;;  %vm523_vm0 = vcmask 7168  }
  0x50   : > { %948 = vsyncadd (%p1153_p10), [#allocation5], 4294955008  ;;  %v208_v2 = vld [vmem:[#allocation4] sm:$0xff]  ;;  %v716_v3 = vpack.c.bf16 %v225_v1, %v224_v0  ;;  %v209_v4 = vld [vmem:[#allocation4 + $0x8] sm:$0xff] }
  0x51   : > { %v256_v5 = vld [vmem:[#allocation4 + $0x180] sm:$0xff]  ;;  %v257_v6 = vld [vmem:[#allocation4 + $0x188] sm:$0xff]  ;;  %v718_v7 = vpack.c.bf16 %v209_v4, %v208_v2  ;;  %v227_v13 = vld [vmem:[#allocation4 + $0x98] sm:$0xff]  ;;  %s1159_s16 = smov (!%p198_p6, %s1008_s16), 1 }
  0x52   : > { %v748_v8 = vpack.c.bf16 %v257_v6, %v256_v5  ;;  %v240_v9 = vld [vmem:[#allocation4 + $0x100] sm:$0xff]  ;;  %v241_v10 = vld [vmem:[#allocation4 + $0x108] sm:$0xff]  ;;  %717 = vmatprep.subr.bf16.mxu0 %v716_v3  ;;  %v210_v14 = vld [vmem:[#allocation4 + $0x10] sm:$0xff]  ;;  %v720_v16 = vpack.c.bf16 %v227_v13, %v226_v11  ;;  %s607_s25 = sshll.u32 %s1159_s16, 3 }
  0x53   : > { %v750_v12 = vpack.c.bf16 %v241_v10, %v240_v9  ;;  %v211_v15 = vld [vmem:[#allocation4 + $0x18] sm:$0xff]  ;;  %719 = vmatpush3.bf16.msra.mxu0 %v718_v7  ;;  %v258_v18 = vld [vmem:[#allocation4 + $0x190] sm:$0xff]  ;;  %v228_v23 = vld [vmem:[#allocation4 + $0xa0] sm:$0xff]  ;;  %s201_s23 = scalar_lea.vmem %s1142_s3, %s607_s25 }
  0x54   : > { %749 = vmatprep.subr.bf16.mxu1 %v748_v8  ;;  %v722_v17 = vpack.c.bf16 %v211_v15, %v210_v14  ;;  %v259_v19 = vld [vmem:[#allocation4 + $0x198] sm:$0xff]  ;;  %v242_v20 = vld [vmem:[#allocation4 + $0x110] sm:$0xff]  ;;  %v229_v24 = vld [vmem:[#allocation4 + $0xa8] sm:$0xff]  ;;  %721 = vmatprep.subr.bf16.mxu0 %v720_v16 }
  0x55   : > { %751 = vmatpush3.bf16.msra.mxu1 %v750_v12  ;;  %v752_v21 = vpack.c.bf16 %v259_v19, %v258_v18  ;;  %v243_v22 = vld [vmem:[#allocation4 + $0x118] sm:$0xff]  ;;  %v724_v26 = vpack.c.bf16 %v229_v24, %v228_v23  ;;  %v212_v27 = vld [vmem:[#allocation4 + $0x20] sm:$0xff]  ;;  %v213_v28 = vld [vmem:[#allocation4 + $0x28] sm:$0xff] }
  0x56   : > { %v754_v25 = vpack.c.bf16 %v243_v22, %v242_v20  ;;  %v260_v29 = vld [vmem:[#allocation4 + $0x1a0] sm:$0xff]  ;;  %v261_v30 = vld [vmem:[#allocation4 + $0x1a8] sm:$0xff]  ;;  %v726_v33 = vpack.c.bf16 %v213_v28, %v212_v27  ;;  %v230_v35 = vld [vmem:[#allocation4 + $0xb0] sm:$0xff] }
  0x57   : > { %753 = vmatprep.subr.bf16.mxu1 %v752_v21  ;;  %v244_v31 = vld [vmem:[#allocation4 + $0x120] sm:$0xff]  ;;  %v245_v32 = vld [vmem:[#allocation4 + $0x128] sm:$0xff]  ;;  %723 = vmatpush3.bf16.msra.mxu0 %v722_v17  ;;  %v756_v34 = vpack.c.bf16 %v261_v30, %v260_v29  ;;  %v231_v36 = vld [vmem:[#allocation4 + $0xb8] sm:$0xff] }
  0x58   : > { %v214_v37 = vld [vmem:[#allocation4 + $0x30] sm:$0xff]  ;;  %725 = vmatprep.subr.bf16.mxu0 %v724_v26  ;;  %v758_v38 = vpack.c.bf16 %v245_v32, %v244_v31  ;;  %v728_v39 = vpack.c.bf16 %v231_v36, %v230_v35  ;;  %v215_v40 = vld [vmem:[#allocation4 + $0x38] sm:$0xff]  ;;  %v232_v46 = vld [vmem:[#allocation4 + $0xc0] sm:$0xff] }
  0x59   : > { %755 = vmatpush3.bf16.msra.mxu1 %v754_v25  ;;  %v262_v41 = vld [vmem:[#allocation4 + $0x1b0] sm:$0xff]  ;;  %v263_v42 = vld [vmem:[#allocation4 + $0x1b8] sm:$0xff]  ;;  %v233_v47 = vld [vmem:[#allocation4 + $0xc8] sm:$0xff]  ;;  %v730_v48 = vpack.c.bf16 %v215_v40, %v214_v37 }
  0x5a   : > { %757 = vmatprep.subr.bf16.mxu1 %v756_v34  ;;  %v760_v43 = vpack.c.bf16 %v263_v42, %v262_v41  ;;  %v246_v44 = vld [vmem:[#allocation4 + $0x130] sm:$0xff]  ;;  %v247_v45 = vld [vmem:[#allocation4 + $0x138] sm:$0xff]  ;;  %v264_v49 = vld [vmem:[#allocation4 + $0x1c0] sm:$0xff]  ;;  %v732_v52 = vpack.c.bf16 %v233_v47, %v232_v46 }
  0x5b   : > { %727 = vmatpush3.bf16.msra.mxu0 %v726_v33  ;;  %v265_v50 = vld [vmem:[#allocation4 + $0x1c8] sm:$0xff]  ;;  %v762_v51 = vpack.c.bf16 %v247_v45, %v246_v44  ;;  %v216_v53 = vld [vmem:[#allocation4 + $0x40] sm:$0xff]  ;;  %v234_v58 = vld [vmem:[#allocation4 + $0xd0] sm:$0xff] }
  0x5c   : > { %729 = vmatprep.subr.bf16.mxu0 %v728_v39  ;;  %v217_v54 = vld [vmem:[#allocation4 + $0x48] sm:$0xff]  ;;  %v248_v55 = vld [vmem:[#allocation4 + $0x140] sm:$0xff]  ;;  %v764_v56 = vpack.c.bf16 %v265_v50, %v264_v49  ;;  %v235_v59 = vld [vmem:[#allocation4 + $0xd8] sm:$0xff] }
  0x5d   : > { %759 = vmatpush3.bf16.msra.mxu1 %v758_v38  ;;  %v249_v57 = vld [vmem:[#allocation4 + $0x148] sm:$0xff]  ;;  %v266_v60 = vld [vmem:[#allocation4 + $0x1d0] sm:$0xff]  ;;  %v267_v61 = vld [vmem:[#allocation4 + $0x1d8] sm:$0xff]  ;;  %v734_v62 = vpack.c.bf16 %v217_v54, %v216_v53  ;;  %v736_v0 = vpack.c.bf16 %v235_v59, %v234_v58 }
  0x5e   : > { %761 = vmatprep.subr.bf16.mxu1 %v760_v43  ;;  %v766_v63 = vpack.c.bf16 %v249_v57, %v248_v55  ;;  %v218_v1 = vld [vmem:[#allocation4 + $0x50] sm:$0xff]  ;;  %v219_v2 = vld [vmem:[#allocation4 + $0x58] sm:$0xff]  ;;  %v768_v4 = vpack.c.bf16 %v267_v61, %v266_v60  ;;  %v236_v6 = vld [vmem:[#allocation4 + $0xe0] sm:$0xff] }
  0x5f   : > { %731 = vmatpush3.bf16.msra.mxu0 %v730_v48  ;;  %v250_v3 = vld [vmem:[#allocation4 + $0x150] sm:$0xff]  ;;  %v251_v5 = vld [vmem:[#allocation4 + $0x158] sm:$0xff]  ;;  %v237_v7 = vld [vmem:[#allocation4 + $0xe8] sm:$0xff]  ;;  %v738_v10 = vpack.c.bf16 %v219_v2, %v218_v1 }
  0x60   : > { %733 = vmatprep.subr.bf16.mxu0 %v732_v52  ;;  %v268_v8 = vld [vmem:[#allocation4 + $0x1e0] sm:$0xff]  ;;  %v269_v9 = vld [vmem:[#allocation4 + $0x1e8] sm:$0xff]  ;;  %v770_v13 = vpack.c.bf16 %v251_v5, %v250_v3  ;;  %v740_v14 = vpack.c.bf16 %v237_v7, %v236_v6  ;;  %v238_v19 = vld [vmem:[#allocation4 + $0xf0] sm:$0xff] }
  0x61   : > { %763 = vmatpush3.bf16.msra.mxu1 %v762_v51  ;;  %v220_v11 = vld [vmem:[#allocation4 + $0x60] sm:$0xff]  ;;  %v203_v12 = vld [vmem:[%s1102_s26 + $0x8] sm:$0xff]  ;;  %v772_v18 = vpack.c.bf16 %v269_v9, %v268_v8  ;;  %v205_v21 = vld [vmem:[%s1102_s26 + $0x18] sm:$0xff] }
  0x62   : > { %765 = vmatprep.subr.bf16.mxu1 %v764_v56  ;;  %v221_v15 = vld [vmem:[#allocation4 + $0x68] sm:$0xff]  ;;  %v252_v16 = vld [vmem:[#allocation4 + $0x160] sm:$0xff]  ;;  %v239_v20 = vld [vmem:[#allocation4 + $0xf8] sm:$0xff]  ;;  %375 = vmatprep.mubr.f32.mxu0 %v203_v12 }
  0x63   : > { %735 = vmatpush3.bf16.msra.mxu0 %v734_v62  ;;  %v253_v17 = vld [vmem:[#allocation4 + $0x168] sm:$0xff]  ;;  %v270_v22 = vld [vmem:[#allocation4 + $0x1f0] sm:$0xff]  ;;  %v271_v23 = vld [vmem:[#allocation4 + $0x1f8] sm:$0xff]  ;;  %445 = vmatprep.mubr.f32.mxu1 %v205_v21  ;;  %v742_v24 = vpack.c.bf16 %v221_v15, %v220_v11  ;;  %v744_v26 = vpack.c.bf16 %v239_v20, %v238_v19 }
  0x64   : > { %737 = vmatprep.subr.bf16.mxu0 %v736_v0  ;;  %v774_v25 = vpack.c.bf16 %v253_v17, %v252_v16  ;;  %v222_v27 = vld [vmem:[#allocation4 + $0x70] sm:$0xff]  ;;  %v223_v28 = vld [vmem:[#allocation4 + $0x78] sm:$0xff]  ;;  %v776_v30 = vpack.c.bf16 %v271_v23, %v270_v22  ;;  %v288_v32 = vld [vmem:[#allocation4 + $0x280] sm:$0xff] }
  0x65   : > { %767 = vmatpush3.bf16.msra.mxu1 %v766_v63  ;;  %v254_v29 = vld [vmem:[#allocation4 + $0x170] sm:$0xff]  ;;  %v255_v31 = vld [vmem:[#allocation4 + $0x178] sm:$0xff]  ;;  %v289_v33 = vld [vmem:[#allocation4 + $0x288] sm:$0xff]  ;;  %v746_v34 = vpack.c.bf16 %v223_v28, %v222_v27 }
  0x66   : > { %769 = vmatprep.subr.bf16.mxu1 %v768_v4  ;;  %v778_v35 = vpack.c.bf16 %v255_v31, %v254_v29  ;;  %v780_v36 = vpack.c.bf16 %v289_v33, %v288_v32  ;;  %v272_v37 = vld [vmem:[#allocation4 + $0x200] sm:$0xff]  ;;  %v273_v38 = vld [vmem:[#allocation4 + $0x208] sm:$0xff]  ;;  %v290_v39 = vld [vmem:[#allocation4 + $0x290] sm:$0xff] }
  0x67   : > { %739 = vmatpush3.bf16.msra.mxu0 %v738_v10  ;;  %v291_v40 = vld [vmem:[#allocation4 + $0x298] sm:$0xff]  ;;  %v202_v41 = vld [vmem:[%s1102_s26] sm:$0xff]  ;;  %v782_v42 = vpack.c.bf16 %v273_v38, %v272_v37  ;;  %v204_v43 = vld [vmem:[%s1102_s26 + $0x10] sm:$0xff] }
  0x68   : > { %741 = vmatprep.subr.bf16.mxu0 %v740_v14  ;;  %v784_v44 = vpack.c.bf16 %v291_v40, %v290_v39  ;;  %v274_v45 = vld [vmem:[#allocation4 + $0x210] sm:$0xff]  ;;  %v275_v46 = vld [vmem:[#allocation4 + $0x218] sm:$0xff]  ;;  %v292_v47 = vld [vmem:[#allocation4 + $0x2a0] sm:$0xff] }
  0x69   : > { %771 = vmatpush3.bf16.msra.mxu1 %v770_v13  ;;  %v293_v48 = vld [vmem:[#allocation4 + $0x2a8] sm:$0xff]  ;;  %v786_v50 = vpack.c.bf16 %v275_v46, %v274_v45  ;;  %v276_v52 = vld [vmem:[#allocation4 + $0x220] sm:$0xff]  ;;  %v294_v54 = vld [vmem:[#allocation4 + $0x2b0] sm:$0xff] }
  0x6a   : > { %773 = vmatprep.subr.bf16.mxu1 %v772_v18  ;;  %v207_v49 = vld [vmem:[%s1102_s26 + $0x28] sm:$0xff]  ;;  %v788_v51 = vpack.c.bf16 %v293_v48, %v292_v47  ;;  %v278_v58 = vld [vmem:[#allocation4 + $0x230] sm:$0xff]  ;;  %v296_v60 = vld [vmem:[#allocation4 + $0x2c0] sm:$0xff] }
  0x6b   : > { %743 = vmatpush3.bf16.msra.mxu0 %v742_v24  ;;  %v277_v53 = vld [vmem:[#allocation4 + $0x228] sm:$0xff]  ;;  %v295_v55 = vld [vmem:[#allocation4 + $0x2b8] sm:$0xff]  ;;  %v280_v0 = vld [vmem:[#allocation4 + $0x240] sm:$0xff] }
  0x6c   : > { %745 = vmatprep.subr.bf16.mxu0 %v744_v26  ;;  %v790_v56 = vpack.c.bf16 %v277_v53, %v276_v52  ;;  %v792_v57 = vpack.c.bf16 %v295_v55, %v294_v54  ;;  %v279_v59 = vld [vmem:[#allocation4 + $0x238] sm:$0xff]  ;;  %v297_v61 = vld [vmem:[#allocation4 + $0x2c8] sm:$0xff]  ;;  %v298_v2 = vld [vmem:[#allocation4 + $0x2d0] sm:$0xff] }
  0x6d   : > { %775 = vmatpush3.bf16.msra.mxu1 %v774_v25  ;;  %v794_v62 = vpack.c.bf16 %v279_v59, %v278_v58  ;;  %v796_v63 = vpack.c.bf16 %v297_v61, %v296_v60  ;;  %v281_v1 = vld [vmem:[#allocation4 + $0x248] sm:$0xff]  ;;  %v299_v3 = vld [vmem:[#allocation4 + $0x2d8] sm:$0xff]  ;;  %v282_v6 = vld [vmem:[#allocation4 + $0x250] sm:$0xff] }
  0x6e   : > { %777 = vmatprep.subr.bf16.mxu1 %v776_v30  ;;  %v798_v4 = vpack.c.bf16 %v281_v1, %v280_v0  ;;  %v800_v5 = vpack.c.bf16 %v299_v3, %v298_v2  ;;  %v283_v7 = vld [vmem:[#allocation4 + $0x258] sm:$0xff]  ;;  %v300_v8 = vld [vmem:[#allocation4 + $0x2e0] sm:$0xff]  ;;  %v301_v9 = vld [vmem:[#allocation4 + $0x2e8] sm:$0xff] }
  0x6f   : > { %747 = vmatpush3.bf16.msra.mxu0 %v746_v34  ;;  %v802_v10 = vpack.c.bf16 %v283_v7, %v282_v6  ;;  %v804_v11 = vpack.c.bf16 %v301_v9, %v300_v8  ;;  %v284_v12 = vld [vmem:[#allocation4 + $0x260] sm:$0xff]  ;;  %v285_v13 = vld [vmem:[#allocation4 + $0x268] sm:$0xff]  ;;  %v302_v14 = vld [vmem:[#allocation4 + $0x2f0] sm:$0xff] }
  0x70   : > { %781 = vmatprep.subr.bf16.mxu0 %v780_v36  ;;  %v303_v15 = vld [vmem:[#allocation4 + $0x2f8] sm:$0xff]  ;;  %v806_v16 = vpack.c.bf16 %v285_v13, %v284_v12  ;;  %v286_v18 = vld [vmem:[#allocation4 + $0x270] sm:$0xff]  ;;  %v608_v23 = vld [vmem:[%s1141_s2] ss:$0 sm:$0xff] }
  0x71   : > { %779 = vmatpush3.bf16.msra.mxu1 %v778_v35  ;;  %v808_v17 = vpack.c.bf16 %v303_v15, %v302_v14  ;;  %v287_v19 = vld [vmem:[#allocation4 + $0x278] sm:$0xff]  ;;  %v206_v21 = vld [vmem:[%s1102_s26 + $0x20] sm:$0xff] }
  0x72   : > { %376 = vmatmul.mubr.f32.vlgmr.msra.gmra.mrb[0].mxu0 %v202_v41  ;;  %v810_v20 = vpack.c.bf16 %v287_v19, %v286_v18 }
  0x73   : > { %783 = vmatpush3.bf16.msra.mxu0 %v782_v42  ;;  %515 = vmatprep.mubr.f32.mxu0 %v207_v49 }
  0x74   : > { %446 = vmatmul.mubr.f32.vlgmr.msra.gmra.mrb[0].mxu1 %v204_v43  ;;  %785 = vmatprep.subr.bf16.mxu0 %v784_v44 }
  0x77   : > { %787 = vmatpush3.bf16.msra.mxu0 %v786_v50 }
  0x78   : > { %789 = vmatprep.subr.bf16.mxu0 %v788_v51 }
  0x7b   : > { %791 = vmatpush3.bf16.msra.mxu0 %v790_v56 }
  0x7c   : > { %793 = vmatprep.subr.bf16.mxu0 %v792_v57 }
  0x7f   : > { %795 = vmatpush3.bf16.msra.mxu0 %v794_v62 }
  0x80   : > { %797 = vmatprep.subr.bf16.mxu0 %v796_v63 }
  0x83   : > { %799 = vmatpush3.bf16.msra.mxu0 %v798_v4 }
  0x84   : > { %801 = vmatprep.subr.bf16.mxu0 %v800_v5 }
  0x87   : > { %803 = vmatpush3.bf16.msra.mxu0 %v802_v10 }
  0x88   : > { %805 = vmatprep.subr.bf16.mxu0 %v804_v11 }
  0x8b   : > { %807 = vmatpush3.bf16.msra.mxu0 %v806_v16 }
  0x8c   : > { %809 = vmatprep.subr.bf16.mxu0 %v808_v17 }
  0x8f   : > { %811 = vmatpush3.bf16.msra.mxu0 %v810_v20 }
  0x92   : > { %516 = vmatmul.mubr.f32.vlgmr.msra.gmra.mrb[2].mxu0 %v206_v21 }
 0x145   : > { %v643_v22 = vpop.f32.mrb[0].mxu0 }
 0x146   : > { %v644_v24 = vpop.f32.mrb[1].mxu0 }
 0x147   : > { %v678_v25 = vpop.f32.mrb[0].mxu1  ;;  %v645_v26 = vadd.f32 %v644_v24, %v643_v22 }
 0x148   : > { %v679_v27 = vpop.f32.mrb[1].mxu1 }
 0x149   : > { %v680_v28 = vadd.f32 %v679_v27, %v678_v25  ;;  %v378_v29 = vadd.f32 %v645_v26, %v608_v23 }
 0x14b   : > { %v448_v30 = vadd.f32 %v680_v28, %v378_v29 }
 0x165   : > { %v713_v31 = vpop.f32.mrb[2].mxu0 }
 0x166   : > { %v714_v32 = vpop.f32.mrb[3].mxu0 }
 0x167   : > { %v715_v33 = vadd.f32 %v714_v32, %v713_v31 }
 0x169   : > { %v518_v34 = vadd.f32 %v715_v33, %v448_v30 }
 0x16b   : > { %521 = vadd.xlane.f32.xlu0 %v518_v34 }
 0x1f8   : > { %v522_v35 = vpop.xlane.xlu0 %521 }
 0x1f9   : > { %524 = vst.msk [vmem:[%s201_s23] sm:$0xff] %vm523_vm0, %v522_v35 }
 0x1fa PF: > { %p14_p8 = scmp.ge.s32.totalorder %s1033_s22, 4   ;;  %s1154_s12 = smov %s955_s13 }
 0x1fb   : > { %s1155_s13 = smov %s959_s14  ;;  %s1156_s14 = smov %s1059_s10 }
 0x1fc   : > { %s1157_s15 = smov %s1033_s22  ;;  %16 = sbr.rel (!%p14_p8) target bundleno = 4 (0x4), region = 76 }
 0x203   :  { %544 = vsyncpa [#allocation3], 1 }
 0x204   :  { %546 = vsyncpa [#allocation3 + $0x1], 1 }
 0x205   :  { %547 = vsyncpa [#allocation5], 1 }

</bundles_post_ra>
